<compile_context>
chip_gen: v7x
topology: tpu7x:2x2x1
jax: 0.10.0
libtpu: 0.0.40
codegen_flags: <defaults>
</compile_context>

<pallas_src>
from typing import Optional, Tuple, Union

import jax
import jax.numpy as jnp
from jax.experimental import pallas as pl
from jax.experimental.pallas import tpu as pltpu


_TARGET_STEP_BYTES = 8 * 1024 * 1024   # ~8 MiB per grid step when work is large
_SINGLE_STEP_BYTES = 2 * _TARGET_STEP_BYTES  # below this, use one grid step


def _parse_crop(crop: Union[int, Tuple]) -> Tuple[Tuple[int, int], ...]:
    """Replicates the slice construction from Crop.__init__.

    Returns a tuple of (left, right) crop amounts for each trailing dim.
    """
    if isinstance(crop, int):
        crop = (crop,) * 2
    pairs = []
    for n_elems in crop:
        if isinstance(n_elems, (tuple, list)):
            pairs.append((int(n_elems[0]), int(n_elems[1])))
        elif isinstance(n_elems, int):
            pairs.append((int(n_elems), int(n_elems)))
        else:
            raise RuntimeError(
                "Expected elements of provided crop to be integers or pairs of integers."
            )
    return tuple(pairs)


def _round_up(x: int, m: int) -> int:
    return (x + m - 1) // m * m


def _padded_plane_bytes(rows: int, cols: int, itemsize: int) -> int:
    """VMEM footprint of one (rows, cols) plane after (sublane, lane) tiling."""
    # Sub-32-bit dtypes pack along sublanes (bf16 -> 16-row tile, int8 -> 32);
    # 32-bit and wider use the base 8-row tile.
    packing = max(1, 4 // itemsize) if itemsize <= 4 else 1
    sublane = 8 * packing
    return _round_up(rows, sublane) * _round_up(cols, 128) * itemsize


def _vmem_limit_bytes() -> int:
    """Scoped-VMEM limit: half of detected physical VMEM, capped at 64 MiB."""
    try:
        cap = int(pltpu.get_tpu_info().vmem_capacity_bytes)
    except Exception:
        cap = 64 * 1024 * 1024  # conservative fallback: assume v7x (64 MiB/TC)
    return max(32 * 1024 * 1024, min(cap // 2, 64 * 1024 * 1024))


def _make_crop_kernel(h0: int, h_out: int, w0: int, w_out: int):
    def crop_kernel(x_ref, o_ref):
        # x_ref: (TB, H, W)      batch of full spatial planes in VMEM.
        # o_ref: (TB, h_out, w_out) cropped planes.  Offsets are static.
        o_ref[...] = x_ref[:, h0:h0 + h_out, w0:w0 + w_out]

    return crop_kernel


def crop(x: jnp.ndarray, crop_spec: Union[int, Tuple],
         _planes_per_step: Optional[int] = None) -> jnp.ndarray:
    """Crop the last two dims of `x` (any rank >= 2) like Crop.forward.

    Equivalent to x[..., h0:H-h1, w0:W-w1] with (h0,h1),(w0,w1) from crop_spec.
    `_planes_per_step` is a test-only override of the planes-per-grid-step.
    """
    pairs = _parse_crop(crop_spec)
    if len(pairs) == 1:
        # Only the last dim is cropped.
        pairs = ((0, 0),) + pairs
    if len(pairs) != 2:
        # TODO(synk): volumetric (3+ trailing-dim) crops are not kernelized.
        raise NotImplementedError("Kernel supports cropping the last one or two dims.")
    if x.ndim < 2:
        raise ValueError("Input must have rank >= 2.")

    (h0, h1), (w0, w1) = pairs
    *lead, H, W = x.shape
    h_out = H - h0 - h1
    w_out = W - w0 - w1

    # --- Degenerate cases: never pay kernel launch / pipeline overhead. -----
    if h_out <= 0 or w_out <= 0:
        return jnp.zeros((*lead, max(h_out, 0), max(w_out, 0)), x.dtype)
    if h0 == h1 == w0 == w1 == 0:
        # Note: the PyTorch module's slice(0, -0) == slice(0, 0) would make
        # the dims empty here (a Python `-0` artefact); we return x unchanged.
        return x

    B = 1
    for d in lead:
        B *= d
    if B == 0:
        return jnp.zeros((*lead, h_out, w_out), x.dtype)

    x3 = x.reshape(B, H, W)
    itemsize = jnp.dtype(x.dtype).itemsize

    # --- Block sizing --------------------------------------------------------
    vmem_limit = _vmem_limit_bytes()
    # Live (input + output) block bytes per grid step.  The pipeline double
    # buffers them, so 2 * block_budget = 0.75 * vmem_limit, leaving headroom
    # for Mosaic's internal scratch / DMA descriptors / semaphores.
    block_budget = (vmem_limit * 3) // 8
    per_plane = (_padded_plane_bytes(H, W, itemsize)
                 + _padded_plane_bytes(h_out, w_out, itemsize))

    if per_plane > block_budget:
        # TODO(synk): an H-tiled kernel for huge planes needs element-offset
        # windows in the tiled dims (not reliably lowerable by Mosaic DMA);
        # fall back to XLA slicing rather than overflow scoped VMEM.
        return x[..., h0:h0 + h_out, w0:w0 + w_out]

    tb_max = max(1, block_budget // per_plane)
    total = B * per_plane
    if _planes_per_step is not None:
        tb = max(1, min(_planes_per_step, tb_max, B))
    elif total <= _SINGLE_STEP_BYTES:
        # Small problem: one grid step; per-step overhead would dominate.
        tb = min(B, tb_max)
    else:
        # Large problem: ~8 MiB steps sit at >=85% of HBM roofline and leave
        # several blocks for pipeline overlap / megacore sharding.
        tb = min(B, tb_max, max(1, _TARGET_STEP_BYTES // per_plane))
    num_chunks = pl.cdiv(B, tb)

    if _planes_per_step is None and num_chunks > 2 and num_chunks % 2 == 1:
        # Prefer an even number of blocks so v7x's two TensorCores split the
        # HBM stream evenly (no effect on single-TC v5e/v6e).
        tb_even = pl.cdiv(B, num_chunks + 1)
        if 1 <= tb_even <= tb_max:
            tb = tb_even
            num_chunks = pl.cdiv(B, tb)

    kernel = _make_crop_kernel(h0, h_out, w0, w_out)

    out3 = pl.pallas_call(
        kernel,
        out_shape=jax.ShapeDtypeStruct((B, h_out, w_out), x.dtype),
        grid=(num_chunks,),
        # Last two block dims equal the full array dims -> always valid under
        # Mosaic's (8, 128) tiling rules for any H/W/dtype and crop offsets.
        in_specs=[pl.BlockSpec((tb, H, W), lambda b: (b, 0, 0))],
        out_specs=pl.BlockSpec((tb, h_out, w_out), lambda b: (b, 0, 0)),
        compiler_params=pltpu.CompilerParams(
            dimension_semantics=("parallel",),
            vmem_limit_bytes=vmem_limit,
        ),
    )(x3)

    return out3.reshape(*lead, h_out, w_out)


if __name__ == "__main__":
    key = jax.random.PRNGKey(0)

    # Small NCHW input consistent with a conv pipeline.
    x = jax.random.normal(key, (2, 4, 16, 16), dtype=jnp.float32)
    # Crop spec mixing the int and (left, right) tuple forms supported by Crop.
    crop_spec = (2, (1, 3))  # H: [2:-2] -> 12, W: [1:-3] -> 12
    out = jax.block_until_ready(crop(x, crop_spec))
    ref = x[..., 2:-2, 1:-3]
    assert out.shape == ref.shape == (2, 4, 12, 12), out.shape
    assert jnp.array_equal(out, ref), "mismatch vs reference slicing (case 1)"

    # Non-square spatial dims; force multiple grid steps with a partial last
    # block (B = 15 planes, 4 per step) to exercise the blocked index_map path.
    x2 = jax.random.normal(jax.random.PRNGKey(0), (3, 5, 64, 96), dtype=jnp.float32)
    out2 = jax.block_until_ready(crop(x2, ((3, 5), 7), _planes_per_step=4))
    ref2 = x2[..., 3:-5, 7:-7]
    assert out2.shape == ref2.shape == (3, 5, 56, 82), out2.shape
    assert jnp.array_equal(out2, ref2), "mismatch vs reference slicing (case 2)"

    # bf16 with packed-sublane-aligned offsets (exercises sub-32-bit tiling).
    x3 = jax.random.normal(jax.random.PRNGKey(0), (2, 3, 32, 40), dtype=jnp.bfloat16)
    out3 = jax.block_until_ready(crop(x3, 2))
    ref3 = x3[..., 2:-2, 2:-2]
    assert out3.shape == ref3.shape == (2, 3, 28, 36), out3.shape
    assert jnp.array_equal(out3, ref3), "mismatch vs reference slicing (case 3)"

    print("KERNEL_OK")
</pallas_src>

<mosaic_0001>
module attributes {stable_mosaic.version = 11 : i64} {
  func.func @crop_kernel(%arg0: i32, %arg1: memref<8x16x16xf32, #tpu.memory_space<vmem>>, %arg2: memref<8x12x12xf32, #tpu.memory_space<vmem>>) attributes {dimension_semantics = [#tpu.dimension_semantics<parallel>], iteration_bounds = array<i64: 1>, scalar_prefetch = 0 : i64, scratch_operands = 0 : i64, tpu.core_type = #tpu.core_type<tc>, window_params = [{transform_indices = @transform_0, window_bounds = array<i64: 8, 16, 16>}, {transform_indices = @transform_1, window_bounds = array<i64: 8, 12, 12>}]} {
    %c0 = arith.constant 0 : index
    %c2 = arith.constant 2 : index
    %c1 = arith.constant 1 : index
    %0 = vector.load %arg1[%c0, %c2, %c1] : memref<8x16x16xf32, #tpu.memory_space<vmem>>, vector<8x12x12xf32>
    %c0_0 = arith.constant 0 : index
    %c0_1 = arith.constant 0 : index
    %c0_2 = arith.constant 0 : index
    %1 = vector.load %arg2[%c0_0, %c0_1, %c0_2] : memref<8x12x12xf32, #tpu.memory_space<vmem>>, vector<8x12x12xf32>
    tpu.vector_store %arg2[%c0_0, %c0_1, %c0_2], %0 {strides = array<i32>} : memref<8x12x12xf32, #tpu.memory_space<vmem>>, vector<8x12x12xf32>,
    return
  }
  func.func @transform_0(%arg0: i32) -> (i32, i32, i32) {
    %c0_i32 = arith.constant 0 : i32
    %c0_i32_0 = arith.constant 0 : i32
    %c0_i32_1 = arith.constant 0 : i32
    return %arg0, %c0_i32, %c0_i32_0 : i32, i32, i32
  }
  func.func @transform_1(%arg0: i32) -> (i32, i32, i32) {
    %c0_i32 = arith.constant 0 : i32
    %c0_i32_0 = arith.constant 0 : i32
    %c0_i32_1 = arith.constant 0 : i32
    return %arg0, %c0_i32, %c0_i32_0 : i32, i32, i32
  }
}

</mosaic_0001>

<bundles_post_ra>
// kernel: tpu_custom_call.1
= control target key start
LH: loop header
LB: loop body
LE: loop exit
PB: predicated region body
PF: predicated region fallthrough
CT: control target
= control target key end

     0   :  { %6 = vsyncpa [#allocation3], 0  ;;  %s153_s6 = smov [#allocation2]   ;;  %s243_s0 = inlined_call_operand.hbm [shape: f32[8,16,16], index: 0, kind: input, shape index: {}]   ;;  %s244_s1 = inlined_call_operand.vmem [shape: f32[8,12,12], index: 1, kind: output, shape index: {}]  }
   0x1   :  { %s12_s7 = sshll.u32 %s153_s6, 4  ;;  %s129_s10 = scalar_lea.hbm %s243_s0, 2048  ;;  %s13_s7 = int_to_ptr.vmem [resolvable:$true] %s12_s7 }
   0x2   :  { %p130_p0 = scmp.ne.s32.totalorder %s243_s0, %s129_s10  ;;  %p133_p1 = scmp.lt.u32.totalorder %s129_s10, %s243_s0 }
   0x4   :  { %p135_p2 = pnand %p133_p1, %p130_p0 }
   0x6   :  { %138 = shalt.err (!%p135_p2)
}
   0x7   :  { %s139_s15 = scalar_lea.vmem %s13_s7, 2048  ;;  %p144_p4 = scmp.lt.s32.totalorder %s13_s7, %s13_s7 }
   0x8   :  { %p140_p3 = scmp.ne.s32.totalorder %s13_s7, %s139_s15  ;;  %p145_p5 = scmp.lt.s32.totalorder %s139_s15, %s139_s15 }
   0xa   :  { %p146_p6 = por %p145_p5, %p144_p4 }
   0xc   :  { %p147_p7 = pnand %p146_p6, %p140_p3 }
   0xe   :  { %150 = shalt.err (!%p147_p7)
}
   0xf   :  { %s154_s16 = smov 128   ;;  %s155_s17 = smov 8  }
  0x10   :  { %18 = dma.hbm_to_vmem [thread:$0]  %s243_s0, 2048, %s13_s7, [#allocation3], %s154_s16, %s154_s16, %s155_s17  }
  0x11   :  { %151 = dma.done.wait [#allocation3], 2048  }
  0x12   :  { %152 = vsyncadd [#allocation3], 4294965248  ;;  %v24_v0 = vld [vmem:[#allocation2 + $0x12] sm:$0xff]  ;;  %v22_v1 = vld [vmem:[#allocation2 + $0x2] sm:$0xff]  ;;  %s156_s20 = smov 127   ;;  %vm102_vm0 = vcmask 97280  }
  0x13   :  { %58 = vrot.lane.b32.xlu1 %v24_v0, %s156_s20  ;;  %54 = vrot.lane.b32.xlu0 %v22_v1, %s156_s20  ;;  %v25_v2 = vld [vmem:[#allocation2 + $0x1a] sm:$0xf]  ;;  %v23_v3 = vld [vmem:[#allocation2 + $0xa] sm:$0xf]  ;;  %v26_v5 = vld [vmem:[#allocation2 + $0x22] sm:$0xff]  ;;  %vm104_vm1 = vcmask 93184  }
  0x14   :  { %v27_v4 = vld [vmem:[#allocation2 + $0x2a] sm:$0xf]  ;;  %v29_v6 = vld [vmem:[#allocation2 + $0x3a] sm:$0xf]  ;;  %v28_v7 = vld [vmem:[#allocation2 + $0x32] sm:$0xff] }
  0x15   :  { %v31_v8 = vld [vmem:[#allocation2 + $0x4a] sm:$0xf]  ;;  %v30_v9 = vld [vmem:[#allocation2 + $0x42] sm:$0xff]  ;;  %v33_v10 = vld [vmem:[#allocation2 + $0x5a] sm:$0xf] }
  0x16   :  { %v32_v11 = vld [vmem:[#allocation2 + $0x52] sm:$0xff]  ;;  %v35_v12 = vld [vmem:[#allocation2 + $0x6a] sm:$0xf]  ;;  %v34_v13 = vld [vmem:[#allocation2 + $0x62] sm:$0xff] }
  0x17   :  { %60 = vrot.lane.b32.xlu1 %v25_v2, %s156_s20  ;;  %56 = vrot.lane.b32.xlu0 %v23_v3, %s156_s20  ;;  %v37_v14 = vld [vmem:[#allocation2 + $0x7a] sm:$0xf]  ;;  %v36_v15 = vld [vmem:[#allocation2 + $0x72] sm:$0xff] }
  0x1b   :  { %64 = vrot.lane.b32.xlu1 %v27_v4, %s156_s20  ;;  %62 = vrot.lane.b32.xlu0 %v26_v5, %s156_s20 }
  0x1f   :  { %68 = vrot.lane.b32.xlu1 %v29_v6, %s156_s20  ;;  %66 = vrot.lane.b32.xlu0 %v28_v7, %s156_s20 }
  0x23   :  { %72 = vrot.lane.b32.xlu1 %v31_v8, %s156_s20  ;;  %70 = vrot.lane.b32.xlu0 %v30_v9, %s156_s20 }
  0x27   :  { %76 = vrot.lane.b32.xlu1 %v33_v10, %s156_s20  ;;  %74 = vrot.lane.b32.xlu0 %v32_v11, %s156_s20 }
  0x2b   :  { %80 = vrot.lane.b32.xlu1 %v35_v12, %s156_s20  ;;  %78 = vrot.lane.b32.xlu0 %v34_v13, %s156_s20 }
  0x2f   :  { %84 = vrot.lane.b32.xlu1 %v37_v14, %s156_s20  ;;  %82 = vrot.lane.b32.xlu0 %v36_v15, %s156_s20 }
  0x85   :  { %v59_v16 = vpop.permute.xlu1 %58  ;;  %v55_v17 = vpop.permute.xlu0 %54 }
  0x86   :  { %106 = vst.msk [vmem:[%s244_s1 + $0x10] sm:$0xff] %vm102_vm0, %v59_v16  ;;  %103 = vst.msk [vmem:[%s244_s1] sm:$0xff] %vm102_vm0, %v55_v17 }
  0x89   :  { %v61_v18 = vpop.permute.xlu1 %60  ;;  %v57_v19 = vpop.permute.xlu0 %56 }
  0x8a   :  { %107 = vst.msk [vmem:[%s244_s1 + $0x18] sm:$0xf] %vm104_vm1, %v61_v18  ;;  %105 = vst.msk [vmem:[%s244_s1 + $0x8] sm:$0xf] %vm104_vm1, %v57_v19 }
  0x8d   :  { %v65_v20 = vpop.permute.xlu1 %64  ;;  %v63_v21 = vpop.permute.xlu0 %62 }
  0x8e   :  { %109 = vst.msk [vmem:[%s244_s1 + $0x28] sm:$0xf] %vm104_vm1, %v65_v20 }
  0x8f   :  { %108 = vst.msk [vmem:[%s244_s1 + $0x20] sm:$0xff] %vm102_vm0, %v63_v21 }
  0x91   :  { %v69_v22 = vpop.permute.xlu1 %68  ;;  %v67_v23 = vpop.permute.xlu0 %66 }
  0x92   :  { %111 = vst.msk [vmem:[%s244_s1 + $0x38] sm:$0xf] %vm104_vm1, %v69_v22 }
  0x93   :  { %110 = vst.msk [vmem:[%s244_s1 + $0x30] sm:$0xff] %vm102_vm0, %v67_v23 }
  0x95   :  { %v73_v24 = vpop.permute.xlu1 %72  ;;  %v71_v25 = vpop.permute.xlu0 %70 }
  0x96   :  { %113 = vst.msk [vmem:[%s244_s1 + $0x48] sm:$0xf] %vm104_vm1, %v73_v24 }
  0x97   :  { %112 = vst.msk [vmem:[%s244_s1 + $0x40] sm:$0xff] %vm102_vm0, %v71_v25 }
  0x99   :  { %v77_v26 = vpop.permute.xlu1 %76  ;;  %v75_v27 = vpop.permute.xlu0 %74 }
  0x9a   :  { %115 = vst.msk [vmem:[%s244_s1 + $0x58] sm:$0xf] %vm104_vm1, %v77_v26 }
  0x9b   :  { %114 = vst.msk [vmem:[%s244_s1 + $0x50] sm:$0xff] %vm102_vm0, %v75_v27 }
  0x9d   :  { %v81_v28 = vpop.permute.xlu1 %80  ;;  %v79_v29 = vpop.permute.xlu0 %78 }
  0x9e   :  { %117 = vst.msk [vmem:[%s244_s1 + $0x68] sm:$0xf] %vm104_vm1, %v81_v28 }
  0x9f   :  { %116 = vst.msk [vmem:[%s244_s1 + $0x60] sm:$0xff] %vm102_vm0, %v79_v29 }
  0xa1   :  { %v85_v30 = vpop.permute.xlu1 %84  ;;  %v83_v31 = vpop.permute.xlu0 %82 }
  0xa2   :  { %119 = vst.msk [vmem:[%s244_s1 + $0x78] sm:$0xf] %vm104_vm1, %v85_v30 }
  0xa3   :  { %118 = vst.msk [vmem:[%s244_s1 + $0x70] sm:$0xff] %vm102_vm0, %v83_v31 }
  0xa4   :  { %124 = vsyncpa [#allocation3], 1 }

</bundles_post_ra>
